<compile_context>
chip_gen: v7x
topology: tpu7x:2x2x1
jax: 0.10.0
libtpu: 0.0.40
codegen_flags: <defaults>
</compile_context>

<pallas_src>
import jax
import jax.numpy as jnp
from jax.experimental import pallas as pl
from jax.experimental.pallas import tpu as pltpu

HIDDEN1 = 128
HIDDEN2 = 64


def _round_up(n, m):
    return ((n + m - 1) // m) * m


def _num_tensorcores():
    """Best-effort detection of TensorCores per chip (v7x has 2)."""
    try:
        kind = jax.devices()[0].device_kind.lower()
    except Exception:
        return 1
    return 2 if ("v7" in kind or "tpu7" in kind) else 1


def _dqn_kernel(x_ref, w1_ref, b1_ref, w2_ref, b2_ref, w3_ref, b3_ref, o_ref):
    """Fused 3-layer MLP on one (TB, in) batch tile.

    All matmuls accumulate in f32 on the MXU; bias adds and ReLU run on the
    f32 accumulators (VPU). Intermediates stay in vregs (no scratch VMEM).
    """
    h1 = jnp.dot(x_ref[...], w1_ref[...], preferred_element_type=jnp.float32)
    h1 = jnp.maximum(h1 + b1_ref[...], 0.0)

    h2 = jnp.dot(h1.astype(w2_ref.dtype), w2_ref[...],
                 preferred_element_type=jnp.float32)
    h2 = jnp.maximum(h2 + b2_ref[...], 0.0)

    o = jnp.dot(h2.astype(w3_ref.dtype), w3_ref[...],
                preferred_element_type=jnp.float32) + b3_ref[...]
    o_ref[...] = o.astype(o_ref.dtype)


def pack_params(params, *, dtype=jnp.float32):
    """One-time packing: call when params change, NOT per forward.

    Pads fc3 to 8 output lanes (full-block store, small writeback) and
    optionally stores weight matrices in a narrow dtype (bf16 on v6e/v7x).
    Biases stay f32 since they are added to the f32 accumulators.
    """
    out_size = params["w3"].shape[1]
    out_w = _round_up(out_size, 8)
    w3 = jnp.zeros((HIDDEN2, out_w), jnp.float32).at[:, :out_size].set(params["w3"])
    b3 = jnp.zeros((1, out_w), jnp.float32).at[:, :out_size].set(params["b3"])
    return {
        "w1": params["w1"].astype(dtype),
        "b1": params["b1"].astype(jnp.float32),
        "w2": params["w2"].astype(dtype),
        "b2": params["b2"].astype(jnp.float32),
        "w3": w3.astype(dtype),
        "b3": b3,
    }


def dqn_forward(x, packed, output_size, *, tb=2048):
    """Fused DQN forward pass.

    x:      (B, input_size) float32
    packed: output of pack_params()
    """
    B, in_size = x.shape
    out_w = packed["w3"].shape[1]

    # Batch tile: multiple of 8. One block when the batch fits; split into two
    # blocks only if a second TensorCore (v7x) can take the other half.
    tb = max(8, (int(tb) // 8) * 8)
    B8 = _round_up(B, 8)
    if B8 <= tb:
        if _num_tensorcores() >= 2 and B8 >= 16:
            TB = _round_up((B8 + 1) // 2, 8)
        else:
            TB = B8
    else:
        TB = tb
    B_pad = _round_up(B, TB)
    grid = (B_pad // TB,)

    if B_pad != B:
        x = jnp.pad(x, ((0, B_pad - B), (0, 0)))
    x = x.astype(packed["w1"].dtype)

    flops = 2 * B_pad * (in_size * HIDDEN1 + HIDDEN1 * HIDDEN2 + HIDDEN2 * out_w)
    bytes_accessed = int(
        x.size * x.dtype.itemsize
        + B_pad * out_w * 4
        + sum(v.size * v.dtype.itemsize for v in packed.values())
    )

    out = pl.pallas_call(
        _dqn_kernel,
        out_shape=jax.ShapeDtypeStruct((B_pad, out_w), jnp.float32),
        grid_spec=pltpu.PrefetchScalarGridSpec(
            num_scalar_prefetch=0,
            grid=grid,
            in_specs=[
                # Only x is pipelined over the batch grid.
                pl.BlockSpec((TB, in_size), lambda i: (i, 0)),
                # Parameters: constant index_map -> fetched once, VMEM-resident.
                pl.BlockSpec((in_size, HIDDEN1), lambda i: (0, 0)),
                pl.BlockSpec((1, HIDDEN1), lambda i: (0, 0)),
                pl.BlockSpec((HIDDEN1, HIDDEN2), lambda i: (0, 0)),
                pl.BlockSpec((1, HIDDEN2), lambda i: (0, 0)),
                pl.BlockSpec((HIDDEN2, out_w), lambda i: (0, 0)),
                pl.BlockSpec((1, out_w), lambda i: (0, 0)),
            ],
            out_specs=pl.BlockSpec((TB, out_w), lambda i: (i, 0)),
        ),
        compiler_params=pltpu.CompilerParams(
            dimension_semantics=("parallel",),
        ),
        cost_estimate=pl.CostEstimate(
            flops=int(flops), transcendentals=0, bytes_accessed=bytes_accessed
        ),
    )(x, packed["w1"], packed["b1"], packed["w2"], packed["b2"],
      packed["w3"], packed["b3"])

    # Strip batch padding and the (small) lane padding of fc3.
    return out[:B, :output_size]


def init_params(key, input_size, output_size):
    """Deterministic init mimicking torch.nn.Linear default (uniform +/- 1/sqrt(fan_in))."""
    dims = [(input_size, HIDDEN1), (HIDDEN1, HIDDEN2), (HIDDEN2, output_size)]
    params = {}
    for i, (fan_in, fan_out) in enumerate(dims, start=1):
        key, kw, kb = jax.random.split(key, 3)
        bound = 1.0 / jnp.sqrt(float(fan_in))
        params[f"w{i}"] = jax.random.uniform(
            kw, (fan_in, fan_out), jnp.float32, -bound, bound
        )
        params[f"b{i}"] = jax.random.uniform(
            kb, (1, fan_out), jnp.float32, -bound, bound
        )
    return params


def dqn_reference(x, params):
    """Pure-JAX reference for correctness checking."""
    h = jnp.maximum(x @ params["w1"] + params["b1"], 0.0)
    h = jnp.maximum(h @ params["w2"] + params["b2"], 0.0)
    return h @ params["w3"] + params["b3"]


# TODO(synk): the gym environment, replay buffer, and optimizer from the
# original script are a training loop, not module compute; only DQN.forward
# is implemented as a kernel.

if __name__ == "__main__":
    input_size = 4    # CartPole-v1 observation dim
    output_size = 2   # CartPole-v1 action dim
    batch = 8         # small demo batch; real use should batch many states

    key = jax.random.PRNGKey(0)
    key, kx = jax.random.split(key)
    x = jax.random.normal(kx, (batch, input_size), dtype=jnp.float32)

    params = init_params(key, input_size, output_size)
    packed = pack_params(params)   # once, outside the per-forward path

    out = dqn_forward(x, packed, output_size)
    out = jax.block_until_ready(out)

    ref = dqn_reference(x, params)
    assert out.shape == (batch, output_size)
    assert jnp.allclose(out, ref, atol=1e-5, rtol=1e-5), "mismatch vs JAX reference"

    print("KERNEL_OK")
</pallas_src>

<mosaic_0001>
module attributes {stable_mosaic.version = 11 : i64} {
  func.func @_dqn_kernel(%arg0: i32, %arg1: memref<8x4xf32, #tpu.memory_space<vmem>>, %arg2: memref<4x128xf32, #tpu.memory_space<vmem>>, %arg3: memref<1x128xf32, #tpu.memory_space<vmem>>, %arg4: memref<128x64xf32, #tpu.memory_space<vmem>>, %arg5: memref<1x64xf32, #tpu.memory_space<vmem>>, %arg6: memref<64x8xf32, #tpu.memory_space<vmem>>, %arg7: memref<1x8xf32, #tpu.memory_space<vmem>>, %arg8: memref<8x8xf32, #tpu.memory_space<vmem>>) attributes {dimension_semantics = [#tpu.dimension_semantics<parallel>], iteration_bounds = array<i64: 1>, scalar_prefetch = 0 : i64, scratch_operands = 0 : i64, tpu.core_type = #tpu.core_type<tc>, window_params = [{transform_indices = @transform_0, window_bounds = array<i64: 8, 4>}, {pipeline_mode = #tpu.pipeline_mode<synchronous>, transform_indices = @transform_1, window_bounds = array<i64: 4, 128>}, {pipeline_mode = #tpu.pipeline_mode<synchronous>, transform_indices = @transform_2, window_bounds = array<i64: 1, 128>}, {pipeline_mode = #tpu.pipeline_mode<synchronous>, transform_indices = @transform_3, window_bounds = array<i64: 128, 64>}, {pipeline_mode = #tpu.pipeline_mode<synchronous>, transform_indices = @transform_4, window_bounds = array<i64: 1, 64>}, {pipeline_mode = #tpu.pipeline_mode<synchronous>, transform_indices = @transform_5, window_bounds = array<i64: 64, 8>}, {pipeline_mode = #tpu.pipeline_mode<synchronous>, transform_indices = @transform_6, window_bounds = array<i64: 1, 8>}, {transform_indices = @transform_7, window_bounds = array<i64: 8, 8>}]} {
    %c0 = arith.constant 0 : index
    %c0_0 = arith.constant 0 : index
    %0 = vector.load %arg1[%c0, %c0_0] : memref<8x4xf32, #tpu.memory_space<vmem>>, vector<8x4xf32>
    %c0_1 = arith.constant 0 : index
    %c0_2 = arith.constant 0 : index
    %1 = vector.load %arg2[%c0_1, %c0_2] : memref<4x128xf32, #tpu.memory_space<vmem>>, vector<4x128xf32>
    %cst = arith.constant dense<0.000000e+00> : vector<8x128xf32>
    %2 = tpu.matmul %0, %1, %cst {dimension_numbers = #tpu.dot_dimension_numbers<[1], [0], [0], [1], [0, 0, 1, 1], [], []>} : vector<8x4xf32>, vector<4x128xf32>, vector<8x128xf32> -> vector<8x128xf32>
    %c0_3 = arith.constant 0 : index
    %c0_4 = arith.constant 0 : index
    %3 = vector.load %arg3[%c0_3, %c0_4] : memref<1x128xf32, #tpu.memory_space<vmem>>, vector<1x128xf32>
    %4 = vector.broadcast %3 : vector<1x128xf32> to vector<8x128xf32>
    %5 = arith.addf %2, %4 : vector<8x128xf32>
    %cst_5 = arith.constant 0.000000e+00 : f32
    %6 = vector.broadcast %cst_5 : f32 to vector<8x128xf32>
    %7 = arith.maximumf %5, %6 : vector<8x128xf32>
    %c0_6 = arith.constant 0 : index
    %c0_7 = arith.constant 0 : index
    %8 = vector.load %arg4[%c0_6, %c0_7] : memref<128x64xf32, #tpu.memory_space<vmem>>, vector<128x64xf32>
    %cst_8 = arith.constant dense<0.000000e+00> : vector<8x64xf32>
    %9 = tpu.matmul %7, %8, %cst_8 {dimension_numbers = #tpu.dot_dimension_numbers<[1], [0], [0], [1], [0, 0, 1, 1], [], []>} : vector<8x128xf32>, vector<128x64xf32>, vector<8x64xf32> -> vector<8x64xf32>
    %c0_9 = arith.constant 0 : index
    %c0_10 = arith.constant 0 : index
    %10 = vector.load %arg5[%c0_9, %c0_10] : memref<1x64xf32, #tpu.memory_space<vmem>>, vector<1x64xf32>
    %11 = vector.broadcast %10 : vector<1x64xf32> to vector<8x64xf32>
    %12 = arith.addf %9, %11 : vector<8x64xf32>
    %cst_11 = arith.constant 0.000000e+00 : f32
    %13 = vector.broadcast %cst_11 : f32 to vector<8x64xf32>
    %14 = arith.maximumf %12, %13 : vector<8x64xf32>
    %c0_12 = arith.constant 0 : index
    %c0_13 = arith.constant 0 : index
    %15 = vector.load %arg6[%c0_12, %c0_13] : memref<64x8xf32, #tpu.memory_space<vmem>>, vector<64x8xf32>
    %cst_14 = arith.constant dense<0.000000e+00> : vector<8x8xf32>
    %16 = tpu.matmul %14, %15, %cst_14 {dimension_numbers = #tpu.dot_dimension_numbers<[1], [0], [0], [1], [0, 0, 1, 1], [], []>} : vector<8x64xf32>, vector<64x8xf32>, vector<8x8xf32> -> vector<8x8xf32>
    %c0_15 = arith.constant 0 : index
    %c0_16 = arith.constant 0 : index
    %17 = vector.load %arg7[%c0_15, %c0_16] : memref<1x8xf32, #tpu.memory_space<vmem>>, vector<1x8xf32>
    %18 = vector.broadcast %17 : vector<1x8xf32> to vector<8x8xf32>
    %19 = arith.addf %16, %18 : vector<8x8xf32>
    %c0_17 = arith.constant 0 : index
    %c0_18 = arith.constant 0 : index
    %20 = vector.load %arg8[%c0_17, %c0_18] : memref<8x8xf32, #tpu.memory_space<vmem>>, vector<8x8xf32>
    tpu.vector_store %arg8[%c0_17, %c0_18], %19 {strides = array<i32>} : memref<8x8xf32, #tpu.memory_space<vmem>>, vector<8x8xf32>,
    return
  }
  func.func @transform_0(%arg0: i32) -> (i32, i32) {
    %c0_i32 = arith.constant 0 : i32
    %c0_i32_0 = arith.constant 0 : i32
    return %arg0, %c0_i32 : i32, i32
  }
  func.func @transform_1(%arg0: i32) -> (i32, i32) {
    %c0_i32 = arith.constant 0 : i32
    %c0_i32_0 = arith.constant 0 : i32
    %c0_i32_1 = arith.constant 0 : i32
    return %c0_i32, %c0_i32_0 : i32, i32
  }
  func.func @transform_2(%arg0: i32) -> (i32, i32) {
    %c0_i32 = arith.constant 0 : i32
    %c0_i32_0 = arith.constant 0 : i32
    %c0_i32_1 = arith.constant 0 : i32
    return %c0_i32, %c0_i32_0 : i32, i32
  }
  func.func @transform_3(%arg0: i32) -> (i32, i32) {
    %c0_i32 = arith.constant 0 : i32
    %c0_i32_0 = arith.constant 0 : i32
    %c0_i32_1 = arith.constant 0 : i32
    return %c0_i32, %c0_i32_0 : i32, i32
  }
  func.func @transform_4(%arg0: i32) -> (i32, i32) {
    %c0_i32 = arith.constant 0 : i32
    %c0_i32_0 = arith.constant 0 : i32
    %c0_i32_1 = arith.constant 0 : i32
    return %c0_i32, %c0_i32_0 : i32, i32
  }
  func.func @transform_5(%arg0: i32) -> (i32, i32) {
    %c0_i32 = arith.constant 0 : i32
    %c0_i32_0 = arith.constant 0 : i32
    %c0_i32_1 = arith.constant 0 : i32
    return %c0_i32, %c0_i32_0 : i32, i32
  }
  func.func @transform_6(%arg0: i32) -> (i32, i32) {
    %c0_i32 = arith.constant 0 : i32
    %c0_i32_0 = arith.constant 0 : i32
    %c0_i32_1 = arith.constant 0 : i32
    return %c0_i32, %c0_i32_0 : i32, i32
  }
  func.func @transform_7(%arg0: i32) -> (i32, i32) {
    %c0_i32 = arith.constant 0 : i32
    %c0_i32_0 = arith.constant 0 : i32
    return %arg0, %c0_i32 : i32, i32
  }
}

</mosaic_0001>

<bundles_post_ra>
// kernel: tpu_custom_call.1
= control target key start
LH: loop header
LB: loop body
LE: loop exit
PB: predicated region body
PF: predicated region fallthrough
CT: control target
= control target key end

     0   :  { %vm40_vm0 = vcmask 1043456   ;;  %v471_v2 = vmov 0.0   ;;  %vm472_vm1 = vmmov 0   ;;  %vm36_vm2 = vcmask 31744   ;;  %s617_s0 = inlined_call_operand.vmem [shape: f32[8,4], index: 0, kind: input, shape index: {}]   ;;  %s618_s1 = inlined_call_operand.vmem [shape: f32[4,128], index: 1, kind: input, shape index: {}]   ;;  %s619_s2 = inlined_call_operand.vmem [shape: f32[1,128], index: 2, kind: input, shape index: {}]   ;;  %s620_s3 = inlined_call_operand.vmem [shape: f32[128,64], index: 3, kind: input, shape index: {}]   ;;  %s621_s4 = inlined_call_operand.vmem [shape: f32[1,64], index: 4, kind: input, shape index: {}]   ;;  %s622_s5 = inlined_call_operand.vmem [shape: f32[64,8], index: 5, kind: input, shape index: {}]   ;;  %s623_s6 = inlined_call_operand.vmem [shape: f32[1,8], index: 6, kind: input, shape index: {}]   ;;  %s624_s7 = inlined_call_operand.hbm [shape: f32[8,8], index: 7, kind: output, shape index: {}]  }
   0x1   :  { %v28_v0 = vld [vmem:[%s618_s1] sm:$0xf]  ;;  %348 = vmatprep.subr.mxu0 %v471_v2  ;;  %350 = vmatprep.mubr.msk.f32.mxu0 %vm472_vm1, %v471_v2  ;;  %v116_v4 = vld [vmem:[%s620_s3 + $0x8] sm:$0xff]  ;;  %v117_v5 = vld [vmem:[%s620_s3 + $0x10] sm:$0xff]  ;;  %v473_v6 = vmov 0.0|0.0  }
   0x2   :  { %v27_v1 = vld [vmem:[%s617_s0] sm:$0xff]  ;;  %349 = vmatpush3.msk.msra.mxu0 %vm40_vm0, %v28_v0  ;;  %407 = vmatprep.subr.bf16.mxu1 %v473_v6  ;;  %v118_v8 = vld [vmem:[%s620_s3 + $0x18] sm:$0xff]  ;;  %v120_v11 = vld [vmem:[%s620_s3 + $0x28] sm:$0xff] }
   0x3   :  { %v115_v3 = vld [vmem:[%s620_s3] sm:$0xff]  ;;  %351 = vmatmul.mubr.msk.f32.vlgmr.msra.gmra.mrb[0].mxu0 %vm36_vm2, %v27_v1  ;;  %385 = vmatprep.mubr.msk.f32.mxu1 %vm472_vm1, %v471_v2  ;;  %v411_v9 = vpack.c.bf16 %v118_v8, %v117_v5 }
   0x4   :  { %v408_v7 = vpack.c.bf16 %v116_v4, %v115_v3  ;;  %431 = vmatprep.subr.bf16.mxu0 %v473_v6  ;;  %v119_v10 = vld [vmem:[%s620_s3 + $0x20] sm:$0xff]  ;;  %404 = vmatprep.mubr.msk.f32.mxu0 %vm472_vm1, %v471_v2 }
   0x6   :  { %409 = vmatpush3.bf16.msra.mxu1 %v408_v7 }
   0x7   :  { %410 = vmatprep.subr.bf16.mxu1 %v473_v6 }
   0x8   :  { %12 = vsyncpa [#allocation3], 0  ;;  %v414_v12 = vpack.c.bf16 %v120_v11, %v119_v10  ;;  %v121_v13 = vld [vmem:[%s620_s3 + $0x30] sm:$0xff]  ;;  %v122_v14 = vld [vmem:[%s620_s3 + $0x38] sm:$0xff]  ;;  %vm224_vm3 = vcmask 523264   ;;  %s474_s30 = smov [#allocation2]  }
   0x9   :  { %v417_v15 = vpack.c.bf16 %v122_v14, %v121_v13  ;;  %v123_v16 = vld [vmem:[%s620_s3 + $0x40] sm:$0xff]  ;;  %v124_v17 = vld [vmem:[%s620_s3 + $0x48] sm:$0xff]  ;;  %v125_v19 = vld [vmem:[%s620_s3 + $0x50] sm:$0xff]  ;;  %s306_s8 = sshll.u32 %s474_s30, 4  ;;  %vm298_vm4 = vcmask 64512   ;;  %s307_s8 = int_to_ptr.vmem [resolvable:$true] %s306_s8 }
   0xa   :  { %412 = vmatpush3.bf16.msra.mxu1 %v411_v9  ;;  %v420_v18 = vpack.c.bf16 %v124_v17, %v123_v16  ;;  %v126_v20 = vld [vmem:[%s620_s3 + $0x58] sm:$0xff]  ;;  %v127_v22 = vld [vmem:[%s620_s3 + $0x60] sm:$0xff]  ;;  %v128_v23 = vld [vmem:[%s620_s3 + $0x68] sm:$0xff]  ;;  %p452_p1 = scmp.lt.s32.totalorder %s307_s8, %s307_s8 }
   0xb   :  { %413 = vmatprep.subr.bf16.mxu1 %v473_v6  ;;  %v423_v21 = vpack.c.bf16 %v126_v20, %v125_v19  ;;  %v426_v24 = vpack.c.bf16 %v128_v23, %v127_v22  ;;  %v129_v25 = vld [vmem:[%s620_s3 + $0x70] sm:$0xff]  ;;  %v130_v26 = vld [vmem:[%s620_s3 + $0x78] sm:$0xff]  ;;  %v209_v28 = vld [vmem:[%s622_s5] sm:$0xff] }
   0xc   :  { %v429_v27 = vpack.c.bf16 %v130_v26, %v129_v25  ;;  %v210_v29 = vld [vmem:[%s622_s5 + $0x8] sm:$0xff]  ;;  %v211_v30 = vld [vmem:[%s622_s5 + $0x10] sm:$0xff]  ;;  %v212_v32 = vld [vmem:[%s622_s5 + $0x18] sm:$0xff] }
   0xd   :  { %v432_v31 = vpack.c.bf16 %v210_v29, %v209_v28  ;;  %v435_v33 = vpack.c.bf16 %v212_v32, %v211_v30  ;;  %v213_v34 = vld [vmem:[%s622_s5 + $0x20] sm:$0xff]  ;;  %v214_v35 = vld [vmem:[%s622_s5 + $0x28] sm:$0xff]  ;;  %v215_v42 = vld [vmem:[%s622_s5 + $0x30] sm:$0xff] }
   0xe   :  { %415 = vmatpush3.bf16.msra.mxu1 %v414_v12  ;;  %v438_v36 = vpack.c.bf16 %v214_v35, %v213_v34  ;;  %v314_v37 = vld [vmem:[%s619_s2] ss:$0 sm:$0xff]  ;;  %v216_v43 = vld [vmem:[%s622_s5 + $0x38] sm:$0xff]  ;;  %s447_s5 = scalar_lea.vmem %s307_s8, 128 }
   0xf   :  { %416 = vmatprep.subr.bf16.mxu1 %v473_v6  ;;  %433 = vmatpush3.bf16.msra.mxu0 %v432_v31  ;;  %v441_v44 = vpack.c.bf16 %v216_v43, %v215_v42  ;;  %v317_v45 = vld [vmem:[%s621_s4] ss:$0 sm:$0xff]  ;;  %p448_p0 = scmp.ne.s32.totalorder %s307_s8, %s447_s5  ;;  %p453_p2 = scmp.lt.s32.totalorder %s447_s5, %s447_s5 }
  0x10   :  { %434 = vmatprep.subr.bf16.mxu0 %v473_v6  ;;  %v318_v50 = vld [vmem:[%s623_s6] ss:$0 sm:$0xff] }
  0x11   :  { %p454_p3 = por %p453_p2, %p452_p1 }
  0x12   :  { %418 = vmatpush3.bf16.msra.mxu1 %v417_v15 }
  0x13   :  { %419 = vmatprep.subr.bf16.mxu1 %v473_v6  ;;  %436 = vmatpush3.bf16.msra.mxu0 %v435_v33  ;;  %p455_p4 = pnand %p454_p3, %p448_p0 }
  0x14   :  { %437 = vmatprep.subr.bf16.mxu0 %v473_v6 }
  0x16   :  { %421 = vmatpush3.bf16.msra.mxu1 %v420_v18 }
  0x17   :  { %422 = vmatprep.subr.bf16.mxu1 %v473_v6  ;;  %439 = vmatpush3.bf16.msra.mxu0 %v438_v36 }
  0x18   :  { %440 = vmatprep.subr.bf16.mxu0 %v473_v6 }
  0x1a   :  { %424 = vmatpush3.bf16.msra.mxu1 %v423_v21 }
  0x1b   :  { %425 = vmatprep.subr.bf16.mxu1 %v473_v6  ;;  %442 = vmatpush3.bf16.msra.mxu0 %v441_v44 }
  0x1e   :  { %427 = vmatpush3.bf16.msra.mxu1 %v426_v24 }
  0x1f   :  { %428 = vmatprep.subr.bf16.mxu1 %v473_v6 }
  0x22   :  { %430 = vmatpush3.bf16.msra.mxu1 %v429_v27 }
  0xd6   :  { %v110_v38 = vpop.f32.mrb[0].mxu0 }
  0xd7   :  { %v111_v39 = vadd.f32 %v314_v37, %v110_v38  ;;  %v352_v40 = vpop.f32.mrb[1].mxu0 }
  0xd9   :  { %v114_v41 = vmax.f32 %v111_v39, 0.0 }
  0xdb   :  { %386 = vmatmul.mubr.f32.vlgmr.msra.gmra.mrb[0].mxu1 %v114_v41 }
 0x1ae   :  { %v204_v46 = vpop.f32.mrb[0].mxu1 }
 0x1af   :  { %v205_v47 = vadd.f32 %v317_v45, %v204_v46  ;;  %v387_v48 = vpop.f32.mrb[1].mxu1 }
 0x1b1   :  { %v208_v49 = vmax.f32 %v205_v47, 0.0 }
 0x1b3   :  { %405 = vmatmul.mubr.msk.f32.vlgmr.msra.gmra.mrb[2].mxu0 %vm224_vm3, %v208_v49 }
 0x286   :  { %v294_v51 = vpop.f32.mrb[2].mxu0 }
 0x287   :  { %v295_v52 = vadd.f32 %v318_v50, %v294_v51  ;;  %v406_v53 = vpop.f32.mrb[3].mxu0 }
 0x289   :  { %299 = vst.msk [vmem:[#allocation2] sm:$0xff] %vm298_vm4, %v295_v52 }
 0x28a   :  { %458 = shalt.err (!%p455_p4)
}
 0x28b   :  { %s459_s9 = scalar_lea.hbm %s624_s7, 128 }
 0x28c   :  { %p460_p5 = scmp.ne.s32.totalorder %s624_s7, %s459_s9  ;;  %p463_p6 = scmp.lt.u32.totalorder %s459_s9, %s624_s7 }
 0x28e   :  { %p465_p7 = pnand %p463_p6, %p460_p5 }
 0x290   :  { %468 = shalt.err (!%p465_p7)
}
 0x291   :  { %309 = dma.vmem_to_hbm [thread:$0]  %s307_s8, 128, %s624_s7, [#allocation3]  }
 0x292   :  { %469 = dma.done.wait [#allocation3], 128  }
 0x293   :  { %470 = vsyncadd [#allocation3], 4294967168 }
 0x294   :  { %313 = vsyncpa [#allocation3], 1 }

</bundles_post_ra>
